<compile_context>
chip_gen: v7x
topology: tpu7x:2x2x1
jax: 0.10.0
libtpu: 0.0.40
codegen_flags: <defaults>
</compile_context>

<pallas_src>
import jax
import jax.numpy as jnp
from jax.experimental import pallas as pl
from jax.experimental.pallas import tpu as pltpu

EPS = 1e-5


def _mlp_kernel(x_ref, w0_ref, wh_ref, gb_ref, wo_ref, bo_ref, o_ref):
    n_hidden = gb_ref.shape[0]          # static python int
    inv_b = 1.0 / x_ref.shape[0]        # static python float

    h = x_ref[...].astype(jnp.float32)

    def bn_relu(h, gb):
        gamma = gb[0:1, :]              # (1, F)
        beta = gb[1:2, :]               # (1, F)
        # One-pass batch stats (biased variance), then a folded affine.
        mean = jnp.sum(h, axis=0, keepdims=True) * inv_b
        ex2 = jnp.sum(h * h, axis=0, keepdims=True) * inv_b
        var = ex2 - mean * mean
        scale = gamma * jax.lax.rsqrt(var + EPS)   # (1, F)  (rsqrt -> EUP)
        shift = beta - mean * scale                # (1, F)
        return jnp.maximum(h * scale + shift, 0.0)

    # Hidden blocks: Linear (no bias; cancelled by BN) -> BN (batch stats) -> ReLU.
    for layer in range(n_hidden):
        w = w0_ref[...] if layer == 0 else wh_ref[layer - 1]
        h = jnp.dot(h, w, preferred_element_type=jnp.float32)
        h = bn_relu(h, gb_ref[layer])

    # Final Linear (bias kept, no BN / activation).
    out = jnp.dot(h, wo_ref[...], preferred_element_type=jnp.float32) + bo_ref[...]
    o_ref[...] = out.astype(o_ref.dtype)


def simple_dense_net_forward(x, packed_params):
    """x: (B, input_size) f32. packed_params: (w0, wh, gb, w_out, b_out)."""
    w0, wh, gb, wo, bo = packed_params
    B = x.shape[0]
    out_dim = wo.shape[1]
    vmem = pl.BlockSpec(memory_space=pltpu.MemorySpace.VMEM)
    return pl.pallas_call(
        _mlp_kernel,
        out_shape=jax.ShapeDtypeStruct((B, out_dim), jnp.float32),
        in_specs=[vmem] * 6,
        out_specs=vmem,
    )(x, w0, wh, gb, wo, bo)


def init_params(key, input_size, hidden_dims, target_size):
    """Torch-default init (U(-1/sqrt(fan_in), 1/sqrt(fan_in)) for Linear W and b;
    BN gamma=1, beta=0). Weights stored as (in, out). Returns the raw, torch-faithful
    per-layer parameters (hidden biases included; used only by the reference)."""
    dims = [input_size, *hidden_dims, target_size]
    n_layers = len(dims) - 1
    keys = jax.random.split(key, 2 * n_layers)
    hidden = []
    for i in range(n_layers - 1):
        fan_in, fan_out = dims[i], dims[i + 1]
        bound = 1.0 / (fan_in ** 0.5)
        w = jax.random.uniform(keys[2 * i], (fan_in, fan_out),
                               minval=-bound, maxval=bound, dtype=jnp.float32)
        b = jax.random.uniform(keys[2 * i + 1], (1, fan_out),
                               minval=-bound, maxval=bound, dtype=jnp.float32)
        gamma = jnp.ones((1, fan_out), jnp.float32)
        beta = jnp.zeros((1, fan_out), jnp.float32)
        hidden.append((w, b, gamma, beta))
    fan_in, fan_out = dims[-2], dims[-1]
    bound = 1.0 / (fan_in ** 0.5)
    w = jax.random.uniform(keys[-2], (fan_in, fan_out),
                           minval=-bound, maxval=bound, dtype=jnp.float32)
    b = jax.random.uniform(keys[-1], (1, fan_out),
                           minval=-bound, maxval=bound, dtype=jnp.float32)
    return {"hidden": hidden, "final": (w, b)}


def pack_params(raw):
    """Pack raw params into a few slabs for the kernel. Hidden biases are dropped
    (cancelled by batch-stat BN). Requires all hidden widths equal (module default)."""
    hidden = raw["hidden"]
    H = hidden[0][0].shape[1]
    assert all(w.shape[1] == H for (w, _, _, _) in hidden), "equal hidden dims expected"
    assert len(hidden) >= 2, "packing assumes >= 2 hidden layers"
    w0 = hidden[0][0]                                               # (in, H)
    wh = jnp.stack([w for (w, _, _, _) in hidden[1:]], axis=0)      # (L-1, H, H)
    gb = jnp.stack([jnp.concatenate([g, t], axis=0)
                    for (_, _, g, t) in hidden], axis=0)            # (L, 2, H)
    wo, bo = raw["final"]
    return w0, wh, gb, wo, bo


def reference_forward(x, raw):
    """Pure-JAX reference faithful to the PyTorch module (hidden biases included,
    training-mode BatchNorm with batch statistics, ReLU)."""
    h = x
    for (w, b, g, t) in raw["hidden"]:
        h = h @ w + b
        mean = h.mean(axis=0, keepdims=True)
        var = ((h - mean) ** 2).mean(axis=0, keepdims=True)
        h = (h - mean) / jnp.sqrt(var + EPS) * g + t
        h = jnp.maximum(h, 0.0)
    w, b = raw["final"]
    return h @ w + b


if __name__ == "__main__":
    # Small shapes consistent with the module: (B, input_size) -> (B, target_size).
    batch = 8
    input_size = 64
    hidden_dims = [32, 32, 32]
    target_size = 10

    key = jax.random.PRNGKey(0)
    kx, kp = jax.random.split(key)
    x = jax.random.normal(kx, (batch, input_size), dtype=jnp.float32)

    raw_params = init_params(kp, input_size, hidden_dims, target_size)
    packed = pack_params(raw_params)

    out = simple_dense_net_forward(x, packed)
    out = jax.block_until_ready(out)

    ref = reference_forward(x, raw_params)
    assert out.shape == (batch, target_size)
    assert jnp.allclose(out, ref, atol=1e-4, rtol=1e-4), "mismatch vs reference"

    print("KERNEL_OK")
</pallas_src>

<mosaic_0001>
module attributes {stable_mosaic.version = 11 : i64} {
  func.func @_mlp_kernel(%arg0: memref<8x64xf32, #tpu.memory_space<vmem>>, %arg1: memref<64x32xf32, #tpu.memory_space<vmem>>, %arg2: memref<2x32x32xf32, #tpu.memory_space<vmem>>, %arg3: memref<3x2x32xf32, #tpu.memory_space<vmem>>, %arg4: memref<32x10xf32, #tpu.memory_space<vmem>>, %arg5: memref<1x10xf32, #tpu.memory_space<vmem>>, %arg6: memref<8x10xf32, #tpu.memory_space<vmem>>) attributes {dimension_semantics = [], scalar_prefetch = 0 : i64, scratch_operands = 0 : i64, tpu.core_type = #tpu.core_type<tc>} {
    %c0 = arith.constant 0 : index
    %c0_0 = arith.constant 0 : index
    %0 = vector.load %arg0[%c0, %c0_0] : memref<8x64xf32, #tpu.memory_space<vmem>>, vector<8x64xf32>
    %c0_1 = arith.constant 0 : index
    %c0_2 = arith.constant 0 : index
    %1 = vector.load %arg1[%c0_1, %c0_2] : memref<64x32xf32, #tpu.memory_space<vmem>>, vector<64x32xf32>
    %cst = arith.constant dense<0.000000e+00> : vector<8x32xf32>
    %2 = tpu.matmul %0, %1, %cst {dimension_numbers = #tpu.dot_dimension_numbers<[1], [0], [0], [1], [0, 0, 1, 1], [], []>} : vector<8x64xf32>, vector<64x32xf32>, vector<8x32xf32> -> vector<8x32xf32>
    %c0_3 = arith.constant 0 : index
    %c0_4 = arith.constant 0 : index
    %c0_5 = arith.constant 0 : index
    %3 = vector.load %arg3[%c0_3, %c0_4, %c0_5] : memref<3x2x32xf32, #tpu.memory_space<vmem>>, vector<1x2x32xf32>
    %4 = vector.shape_cast %3 : vector<1x2x32xf32> to vector<2x32xf32>
    %5 = vector.extract_strided_slice %4 {offsets = [0, 0], sizes = [1, 32], strides = [1, 1]} : vector<2x32xf32> to vector<1x32xf32>
    %6 = vector.extract_strided_slice %4 {offsets = [1, 0], sizes = [1, 32], strides = [1, 1]} : vector<2x32xf32> to vector<1x32xf32>
    %cst_6 = arith.constant dense<0.000000e+00> : vector<32xf32>
    %7 = vector.multi_reduction <add>, %2, %cst_6 [0] : vector<8x32xf32> to vector<32xf32>
    %8 = vector.shape_cast %7 : vector<32xf32> to vector<1x32xf32>
    %cst_7 = arith.constant 1.250000e-01 : f32
    %9 = vector.broadcast %cst_7 : f32 to vector<1x32xf32>
    %10 = arith.mulf %8, %9 : vector<1x32xf32>
    %11 = arith.mulf %2, %2 : vector<8x32xf32>
    %cst_8 = arith.constant dense<0.000000e+00> : vector<32xf32>
    %12 = vector.multi_reduction <add>, %11, %cst_8 [0] : vector<8x32xf32> to vector<32xf32>
    %13 = vector.shape_cast %12 : vector<32xf32> to vector<1x32xf32>
    %cst_9 = arith.constant 1.250000e-01 : f32
    %14 = vector.broadcast %cst_9 : f32 to vector<1x32xf32>
    %15 = arith.mulf %13, %14 : vector<1x32xf32>
    %16 = arith.mulf %10, %10 : vector<1x32xf32>
    %17 = arith.subf %15, %16 : vector<1x32xf32>
    %cst_10 = arith.constant 9.99999974E-6 : f32
    %18 = vector.broadcast %cst_10 : f32 to vector<1x32xf32>
    %19 = arith.addf %17, %18 : vector<1x32xf32>
    %20 = math.rsqrt %19 : vector<1x32xf32>
    %21 = arith.mulf %5, %20 : vector<1x32xf32>
    %22 = arith.mulf %10, %21 : vector<1x32xf32>
    %23 = arith.subf %6, %22 : vector<1x32xf32>
    %24 = vector.broadcast %21 : vector<1x32xf32> to vector<8x32xf32>
    %25 = arith.mulf %2, %24 : vector<8x32xf32>
    %26 = vector.broadcast %23 : vector<1x32xf32> to vector<8x32xf32>
    %27 = arith.addf %25, %26 : vector<8x32xf32>
    %cst_11 = arith.constant 0.000000e+00 : f32
    %28 = vector.broadcast %cst_11 : f32 to vector<8x32xf32>
    %29 = arith.maximumf %27, %28 : vector<8x32xf32>
    %c0_12 = arith.constant 0 : index
    %c0_13 = arith.constant 0 : index
    %c0_14 = arith.constant 0 : index
    %30 = vector.load %arg2[%c0_12, %c0_13, %c0_14] : memref<2x32x32xf32, #tpu.memory_space<vmem>>, vector<1x32x32xf32>
    %31 = vector.shape_cast %30 : vector<1x32x32xf32> to vector<32x32xf32>
    %cst_15 = arith.constant dense<0.000000e+00> : vector<8x32xf32>
    %32 = tpu.matmul %29, %31, %cst_15 {dimension_numbers = #tpu.dot_dimension_numbers<[1], [0], [0], [1], [0, 0, 1, 1], [], []>} : vector<8x32xf32>, vector<32x32xf32>, vector<8x32xf32> -> vector<8x32xf32>
    %c1 = arith.constant 1 : index
    %c0_16 = arith.constant 0 : index
    %c0_17 = arith.constant 0 : index
    %33 = vector.load %arg3[%c1, %c0_16, %c0_17] : memref<3x2x32xf32, #tpu.memory_space<vmem>>, vector<1x2x32xf32>
    %34 = vector.shape_cast %33 : vector<1x2x32xf32> to vector<2x32xf32>
    %35 = vector.extract_strided_slice %34 {offsets = [0, 0], sizes = [1, 32], strides = [1, 1]} : vector<2x32xf32> to vector<1x32xf32>
    %36 = vector.extract_strided_slice %34 {offsets = [1, 0], sizes = [1, 32], strides = [1, 1]} : vector<2x32xf32> to vector<1x32xf32>
    %cst_18 = arith.constant dense<0.000000e+00> : vector<32xf32>
    %37 = vector.multi_reduction <add>, %32, %cst_18 [0] : vector<8x32xf32> to vector<32xf32>
    %38 = vector.shape_cast %37 : vector<32xf32> to vector<1x32xf32>
    %cst_19 = arith.constant 1.250000e-01 : f32
    %39 = vector.broadcast %cst_19 : f32 to vector<1x32xf32>
    %40 = arith.mulf %38, %39 : vector<1x32xf32>
    %41 = arith.mulf %32, %32 : vector<8x32xf32>
    %cst_20 = arith.constant dense<0.000000e+00> : vector<32xf32>
    %42 = vector.multi_reduction <add>, %41, %cst_20 [0] : vector<8x32xf32> to vector<32xf32>
    %43 = vector.shape_cast %42 : vector<32xf32> to vector<1x32xf32>
    %cst_21 = arith.constant 1.250000e-01 : f32
    %44 = vector.broadcast %cst_21 : f32 to vector<1x32xf32>
    %45 = arith.mulf %43, %44 : vector<1x32xf32>
    %46 = arith.mulf %40, %40 : vector<1x32xf32>
    %47 = arith.subf %45, %46 : vector<1x32xf32>
    %cst_22 = arith.constant 9.99999974E-6 : f32
    %48 = vector.broadcast %cst_22 : f32 to vector<1x32xf32>
    %49 = arith.addf %47, %48 : vector<1x32xf32>
    %50 = math.rsqrt %49 : vector<1x32xf32>
    %51 = arith.mulf %35, %50 : vector<1x32xf32>
    %52 = arith.mulf %40, %51 : vector<1x32xf32>
    %53 = arith.subf %36, %52 : vector<1x32xf32>
    %54 = vector.broadcast %51 : vector<1x32xf32> to vector<8x32xf32>
    %55 = arith.mulf %32, %54 : vector<8x32xf32>
    %56 = vector.broadcast %53 : vector<1x32xf32> to vector<8x32xf32>
    %57 = arith.addf %55, %56 : vector<8x32xf32>
    %cst_23 = arith.constant 0.000000e+00 : f32
    %58 = vector.broadcast %cst_23 : f32 to vector<8x32xf32>
    %59 = arith.maximumf %57, %58 : vector<8x32xf32>
    %c1_24 = arith.constant 1 : index
    %c0_25 = arith.constant 0 : index
    %c0_26 = arith.constant 0 : index
    %60 = vector.load %arg2[%c1_24, %c0_25, %c0_26] : memref<2x32x32xf32, #tpu.memory_space<vmem>>, vector<1x32x32xf32>
    %61 = vector.shape_cast %60 : vector<1x32x32xf32> to vector<32x32xf32>
    %cst_27 = arith.constant dense<0.000000e+00> : vector<8x32xf32>
    %62 = tpu.matmul %59, %61, %cst_27 {dimension_numbers = #tpu.dot_dimension_numbers<[1], [0], [0], [1], [0, 0, 1, 1], [], []>} : vector<8x32xf32>, vector<32x32xf32>, vector<8x32xf32> -> vector<8x32xf32>
    %c2 = arith.constant 2 : index
    %c0_28 = arith.constant 0 : index
    %c0_29 = arith.constant 0 : index
    %63 = vector.load %arg3[%c2, %c0_28, %c0_29] : memref<3x2x32xf32, #tpu.memory_space<vmem>>, vector<1x2x32xf32>
    %64 = vector.shape_cast %63 : vector<1x2x32xf32> to vector<2x32xf32>
    %65 = vector.extract_strided_slice %64 {offsets = [0, 0], sizes = [1, 32], strides = [1, 1]} : vector<2x32xf32> to vector<1x32xf32>
    %66 = vector.extract_strided_slice %64 {offsets = [1, 0], sizes = [1, 32], strides = [1, 1]} : vector<2x32xf32> to vector<1x32xf32>
    %cst_30 = arith.constant dense<0.000000e+00> : vector<32xf32>
    %67 = vector.multi_reduction <add>, %62, %cst_30 [0] : vector<8x32xf32> to vector<32xf32>
    %68 = vector.shape_cast %67 : vector<32xf32> to vector<1x32xf32>
    %cst_31 = arith.constant 1.250000e-01 : f32
    %69 = vector.broadcast %cst_31 : f32 to vector<1x32xf32>
    %70 = arith.mulf %68, %69 : vector<1x32xf32>
    %71 = arith.mulf %62, %62 : vector<8x32xf32>
    %cst_32 = arith.constant dense<0.000000e+00> : vector<32xf32>
    %72 = vector.multi_reduction <add>, %71, %cst_32 [0] : vector<8x32xf32> to vector<32xf32>
    %73 = vector.shape_cast %72 : vector<32xf32> to vector<1x32xf32>
    %cst_33 = arith.constant 1.250000e-01 : f32
    %74 = vector.broadcast %cst_33 : f32 to vector<1x32xf32>
    %75 = arith.mulf %73, %74 : vector<1x32xf32>
    %76 = arith.mulf %70, %70 : vector<1x32xf32>
    %77 = arith.subf %75, %76 : vector<1x32xf32>
    %cst_34 = arith.constant 9.99999974E-6 : f32
    %78 = vector.broadcast %cst_34 : f32 to vector<1x32xf32>
    %79 = arith.addf %77, %78 : vector<1x32xf32>
    %80 = math.rsqrt %79 : vector<1x32xf32>
    %81 = arith.mulf %65, %80 : vector<1x32xf32>
    %82 = arith.mulf %70, %81 : vector<1x32xf32>
    %83 = arith.subf %66, %82 : vector<1x32xf32>
    %84 = vector.broadcast %81 : vector<1x32xf32> to vector<8x32xf32>
    %85 = arith.mulf %62, %84 : vector<8x32xf32>
    %86 = vector.broadcast %83 : vector<1x32xf32> to vector<8x32xf32>
    %87 = arith.addf %85, %86 : vector<8x32xf32>
    %cst_35 = arith.constant 0.000000e+00 : f32
    %88 = vector.broadcast %cst_35 : f32 to vector<8x32xf32>
    %89 = arith.maximumf %87, %88 : vector<8x32xf32>
    %c0_36 = arith.constant 0 : index
    %c0_37 = arith.constant 0 : index
    %90 = vector.load %arg4[%c0_36, %c0_37] : memref<32x10xf32, #tpu.memory_space<vmem>>, vector<32x10xf32>
    %cst_38 = arith.constant dense<0.000000e+00> : vector<8x10xf32>
    %91 = tpu.matmul %89, %90, %cst_38 {dimension_numbers = #tpu.dot_dimension_numbers<[1], [0], [0], [1], [0, 0, 1, 1], [], []>} : vector<8x32xf32>, vector<32x10xf32>, vector<8x10xf32> -> vector<8x10xf32>
    %c0_39 = arith.constant 0 : index
    %c0_40 = arith.constant 0 : index
    %92 = vector.load %arg5[%c0_39, %c0_40] : memref<1x10xf32, #tpu.memory_space<vmem>>, vector<1x10xf32>
    %93 = vector.broadcast %92 : vector<1x10xf32> to vector<8x10xf32>
    %94 = arith.addf %91, %93 : vector<8x10xf32>
    %c0_41 = arith.constant 0 : index
    %c0_42 = arith.constant 0 : index
    %95 = vector.load %arg6[%c0_41, %c0_42] : memref<8x10xf32, #tpu.memory_space<vmem>>, vector<8x10xf32>
    tpu.vector_store %arg6[%c0_41, %c0_42], %94 {strides = array<i32>} : memref<8x10xf32, #tpu.memory_space<vmem>>, vector<8x10xf32>,
    return
  }
}

</mosaic_0001>

<bundles_post_ra>
// kernel: tpu_custom_call.1
= control target key start
LH: loop header
LB: loop body
LE: loop exit
PB: predicated region body
PF: predicated region fallthrough
CT: control target
= control target key end

     0   :  { %v633_v3 = vmov 0.0|0.0   ;;  %vm634_vm0 = vmmov 0   ;;  %v635_v6 = vmov 0.0   ;;  %s796_s0 = inlined_call_operand.vmem [shape: f32[8,64], index: 0, kind: input, shape index: {}]   ;;  %s797_s1 = inlined_call_operand.vmem [shape: f32[64,32], index: 1, kind: input, shape index: {}]   ;;  %s798_s2 = inlined_call_operand.vmem [shape: f32[2,32,32], index: 2, kind: input, shape index: {}]   ;;  %s799_s3 = inlined_call_operand.vmem [shape: f32[3,2,32], index: 3, kind: input, shape index: {}]   ;;  %s800_s4 = inlined_call_operand.vmem [shape: f32[32,10], index: 4, kind: input, shape index: {}]   ;;  %s801_s5 = inlined_call_operand.vmem [shape: f32[1,10], index: 5, kind: input, shape index: {}]   ;;  %s802_s6 = inlined_call_operand.hbm [shape: f32[8,10], index: 6, kind: output, shape index: {}]  }
   0x1   :  { %v25_v0 = vld [vmem:[%s797_s1] sm:$0xff]  ;;  %v26_v1 = vld [vmem:[%s797_s1 + $0x8] sm:$0xff]  ;;  %v27_v2 = vld [vmem:[%s797_s1 + $0x10] sm:$0xff]  ;;  %569 = vmatprep.subr.bf16.mxu0 %v633_v3  ;;  %533 = vmatprep.mubr.msk.f32.mxu0 %vm634_vm0, %v635_v6 }
   0x2   :  { %v570_v4 = vpack.c.bf16 %v26_v1, %v25_v0  ;;  %v28_v5 = vld [vmem:[%s797_s1 + $0x18] sm:$0xff]  ;;  %581 = vmatprep.subr.bf16.mxu1 %v633_v3  ;;  %544 = vmatprep.mubr.msk.f32.mxu1 %vm634_vm0, %v635_v6 }
   0x3   :  { %v573_v7 = vpack.c.bf16 %v28_v5, %v27_v2 }
   0x4   :  { %571 = vmatpush3.bf16.msra.mxu0 %v570_v4 }
   0x5   :  { %11 = vsyncpa [#allocation3], 0  ;;  %572 = vmatprep.subr.bf16.mxu0 %v633_v3  ;;  %v29_v8 = vld [vmem:[%s797_s1 + $0x20] sm:$0xff]  ;;  %v30_v9 = vld [vmem:[%s797_s1 + $0x28] sm:$0xff]  ;;  %vm33_vm1 = vcmask 523264   ;;  %vm108_vm2 = vcmask 261120   ;;  %v136_v43 = vlaneseq }
   0x6   :  { %v576_v10 = vpack.c.bf16 %v30_v9, %v29_v8  ;;  %v31_v11 = vld [vmem:[%s797_s1 + $0x30] sm:$0xff]  ;;  %v32_v12 = vld [vmem:[%s797_s1 + $0x38] sm:$0xff]  ;;  %v24_v14 = vld [vmem:[%s796_s0] sm:$0xff]  ;;  %s636_s0 = smov [#allocation2]   ;;  %vm466_vm3 = vcmask 80896  }
   0x7   :  { %v579_v13 = vpack.c.bf16 %v32_v12, %v31_v11  ;;  %v147_v15 = vld [vmem:[%s798_s2] sm:$0xff]  ;;  %v148_v16 = vld [vmem:[%s798_s2 + $0x8] sm:$0xff]  ;;  %v149_v18 = vld [vmem:[%s798_s2 + $0x10] sm:$0xff]  ;;  %v137_v44 = vshrl.u32 %v136_v43, 7 }
   0x8   :  { %574 = vmatpush3.bf16.msra.mxu0 %v573_v7  ;;  %v582_v17 = vpack.c.bf16 %v148_v16, %v147_v15  ;;  %v150_v19 = vld [vmem:[%s798_s2 + $0x18] sm:$0xff]  ;;  %v107_v45 = vld [vmem:[%s799_s3] sm:$0x3]  ;;  %v486_v59 = vld [vmem:[%s798_s2 + $0x28] sm:$0xff] }
   0x9   :  { %575 = vmatprep.subr.bf16.mxu0 %v633_v3  ;;  %v585_v20 = vpack.c.bf16 %v150_v19, %v149_v18  ;;  %v730_v48 = vsub.s32 0, %v137_v44  ;;  %v733_v52 = vsub.s32 1, %v137_v44  ;;  %v485_v58 = vld [vmem:[%s798_s2 + $0x20] sm:$0xff]  ;;  %v487_v61 = vld [vmem:[%s798_s2 + $0x30] sm:$0xff]  ;;  %v488_v62 = vld [vmem:[%s798_s2 + $0x38] sm:$0xff] }
   0xa   :  { %583 = vmatpush3.bf16.msra.mxu1 %v582_v17  ;;  %v588_v60 = vpack.c.bf16 %v486_v59, %v485_v58  ;;  %v591_v63 = vpack.c.bf16 %v488_v62, %v487_v61 }
   0xb   :  { %584 = vmatprep.subr.bf16.mxu1 %v633_v3 }
   0xc   :  { %577 = vmatpush3.bf16.msra.mxu0 %v576_v10 }
   0xd   :  { %578 = vmatprep.subr.bf16.mxu0 %v633_v3 }
   0xe   :  { %586 = vmatpush3.bf16.msra.mxu1 %v585_v20 }
   0xf   :  { %587 = vmatprep.subr.bf16.mxu1 %v633_v3 }
  0x10   :  { %580 = vmatpush3.bf16.msra.mxu0 %v579_v13 }
  0x11   :  { %593 = vmatprep.subr.bf16.mxu0 %v633_v3 }
  0x13   :  { %534 = vmatmul.mubr.msk.f32.vlgmr.msra.gmra.mrb[0].mxu0 %vm33_vm1, %v24_v14 }
  0x14   :  { %566 = vmatprep.mubr.msk.f32.mxu0 %vm634_vm0, %v635_v6 }
  0xe6   :  { %v103_v21 = vpop.f32.mrb[0].mxu0 }
  0xe7   :  { %v109_v22 = vsel %vm108_vm2, %v103_v21, 0.0  ;;  %v117_v23 = vmul.f32 %v103_v21, %v103_v21  ;;  %v535_v24 = vpop.f32.mrb[1].mxu0 }
  0xe8   :  { %v110_v25 = vrot.slane %v109_v22, 4 }
  0xe9   :  { %v118_v26 = vsel %vm108_vm2, %v117_v23, 0.0  ;;  %v484_v23 = vld [vmem:[%s799_s3 + $0x2] sm:$0x3] }
  0xea   :  { %v111_v27 = vadd.f32 %v110_v25, %v109_v22  ;;  %v119_v28 = vrot.slane %v118_v26, 4 }
  0xec   :  { %v112_v29 = vrot.slane %v111_v27, 2  ;;  %v120_v30 = vadd.f32 %v119_v28, %v118_v26 }
  0xee   :  { %v113_v31 = vadd.f32 %v112_v29, %v111_v27  ;;  %v121_v32 = vrot.slane %v120_v30, 2 }
  0xf0   :  { %v114_v33 = vrot.slane %v113_v31, 1  ;;  %v122_v34 = vadd.f32 %v121_v32, %v120_v30 }
  0xf2   :  { %v115_v35 = vadd.f32 %v114_v33, %v113_v31  ;;  %v123_v36 = vrot.slane %v122_v34, 1 }
  0xf4   :  { %v116_v37 = vmul.f32 0.125, %v115_v35  ;;  %v124_v38 = vadd.f32 %v123_v36, %v122_v34  ;;  %v382_v34 = vld [vmem:[%s800_s4] sm:$0xff]  ;;  %v383_v35 = vld [vmem:[%s800_s4 + $0x8] sm:$0xff] }
  0xf5   :  { %v594_v36 = vpack.c.bf16 %v383_v35, %v382_v34 }
  0xf6   :  { %v125_v39 = vmul.f32 0.125, %v124_v38  ;;  %v126_v40 = vmul.f32 %v116_v37, %v116_v37  ;;  %v385_v38 = vld [vmem:[%s800_s4 + $0x18] sm:$0xff] }
  0xf7   :  { %595 = vmatpush3.bf16.msra.mxu0 %v594_v36 }
  0xf8   :  { %v127_v41 = vsub.f32 %v125_v39, %v126_v40  ;;  %596 = vmatprep.subr.bf16.mxu0 %v633_v3 }
  0xfa   :  { %v128_v42 = vadd.f32 1e-05, %v127_v41 }
  0xfc   :  { %603 = vrsqrt.f32 %v128_v42 }
 0x106   :  { %v604_v46 = vpop.eup %603 }
 0x107   :  { %v130_v47 = vmul.f32 %v604_v46, %v107_v45 }
 0x109   :  { %v131_v49 = vmul.f32 %v130_v47, %v116_v37  ;;  %v139_v51 = vrot.slane %v130_v47, %v730_v48  ;;  %v384_v37 = vld [vmem:[%s800_s4 + $0x10] sm:$0xff] }
 0x10a   :  { %v597_v39 = vpack.c.bf16 %v385_v38, %v384_v37 }
 0x10b   :  { %v133_v50 = vrot.slane %v131_v49, 7  ;;  %v140_v54 = vmul.f32 %v139_v51, %v103_v21 }
 0x10c   :  { %598 = vmatpush3.bf16.msra.mxu0 %v597_v39 }
 0x10d   :  { %v135_v53 = vsub.f32 %v107_v45, %v133_v50 }
 0x10f   :  { %v144_v55 = vrot.slane %v135_v53, %v733_v52 }
 0x111   :  { %v145_v56 = vadd.f32 %v144_v55, %v140_v54 }
 0x113   :  { %v146_v57 = vmax.f32 %v145_v56, 0.0 }
 0x115   :  { %545 = vmatmul.mubr.msk.f32.vlgmr.msra.gmra.mrb[0].mxu1 %vm108_vm2, %v146_v57 }
 0x116   :  { %555 = vmatprep.mubr.msk.f32.mxu1 %vm634_vm0, %v635_v6  ;;  %589 = vmatpush3.bf16.msra.mxu1 %v588_v60 }
 0x117   :  { %590 = vmatprep.subr.bf16.mxu1 %v633_v3 }
 0x11a   :  { %592 = vmatpush3.bf16.msra.mxu1 %v591_v63  ;;  %v490_v63 = vld [vmem:[%s799_s3 + $0x4] sm:$0x3]  ;;  %s474_s3 = sshll.u32 %s636_s0, 4  ;;  %s475_s3 = int_to_ptr.vmem [resolvable:$true] %s474_s3 }
 0x11b   :  { %s609_s18 = scalar_lea.vmem %s475_s3, 128  ;;  %p614_p1 = scmp.lt.s32.totalorder %s475_s3, %s475_s3 }
 0x11c   :  { %p610_p0 = scmp.ne.s32.totalorder %s475_s3, %s609_s18  ;;  %p615_p2 = scmp.lt.s32.totalorder %s609_s18, %s609_s18 }
 0x11e   :  { %p616_p3 = por %p615_p2, %p614_p1 }
 0x120   :  { %p617_p4 = pnand %p616_p3, %p610_p0 }
 0x1e8   :  { %v220_v0 = vpop.f32.mrb[0].mxu1 }
 0x1e9   :  { %v226_v1 = vsel %vm108_vm2, %v220_v0, 0.0  ;;  %v234_v2 = vmul.f32 %v220_v0, %v220_v0  ;;  %v546_v4 = vpop.f32.mrb[1].mxu1 }
 0x1ea   :  { %v227_v5 = vrot.slane %v226_v1, 4 }
 0x1eb   :  { %v235_v6 = vsel %vm108_vm2, %v234_v2, 0.0 }
 0x1ec   :  { %v228_v7 = vadd.f32 %v227_v5, %v226_v1  ;;  %v236_v8 = vrot.slane %v235_v6, 4 }
 0x1ee   :  { %v229_v9 = vrot.slane %v228_v7, 2  ;;  %v237_v10 = vadd.f32 %v236_v8, %v235_v6 }
 0x1f0   :  { %v230_v11 = vadd.f32 %v229_v9, %v228_v7  ;;  %v238_v12 = vrot.slane %v237_v10, 2 }
 0x1f2   :  { %v231_v13 = vrot.slane %v230_v11, 1  ;;  %v239_v14 = vadd.f32 %v238_v12, %v237_v10 }
 0x1f4   :  { %v232_v15 = vadd.f32 %v231_v13, %v230_v11  ;;  %v240_v16 = vrot.slane %v239_v14, 1  ;;  %v491_v11 = vld [vmem:[%s801_s5] ss:$0 sm:$0xff] }
 0x1f6   :  { %v233_v17 = vmul.f32 0.125, %v232_v15  ;;  %v241_v18 = vadd.f32 %v240_v16, %v239_v14 }
 0x1f8   :  { %v242_v19 = vmul.f32 0.125, %v241_v18  ;;  %v243_v20 = vmul.f32 %v233_v17, %v233_v17 }
 0x1fa   :  { %v244_v21 = vsub.f32 %v242_v19, %v243_v20 }
 0x1fc   :  { %v245_v22 = vadd.f32 1e-05, %v244_v21 }
 0x1fe   :  { %605 = vrsqrt.f32 %v245_v22 }
 0x208   :  { %v606_v24 = vpop.eup %605 }
 0x209   :  { %v247_v25 = vmul.f32 %v606_v24, %v484_v23 }
 0x20b   :  { %v248_v26 = vmul.f32 %v247_v25, %v233_v17  ;;  %v256_v28 = vrot.slane %v247_v25, %v730_v48 }
 0x20d   :  { %v250_v27 = vrot.slane %v248_v26, 7  ;;  %v257_v30 = vmul.f32 %v256_v28, %v220_v0 }
 0x20f   :  { %v252_v29 = vsub.f32 %v484_v23, %v250_v27 }
 0x211   :  { %v261_v31 = vrot.slane %v252_v29, %v733_v52 }
 0x213   :  { %v262_v32 = vadd.f32 %v261_v31, %v257_v30 }
 0x215   :  { %v263_v33 = vmax.f32 %v262_v32, 0.0 }
 0x217   :  { %556 = vmatmul.mubr.msk.f32.vlgmr.msra.gmra.mrb[2].mxu1 %vm108_vm2, %v263_v33 }
 0x2ea   :  { %v338_v40 = vpop.f32.mrb[2].mxu1 }
 0x2eb   :  { %v344_v41 = vsel %vm108_vm2, %v338_v40, 0.0  ;;  %v352_v42 = vmul.f32 %v338_v40, %v338_v40  ;;  %v557_v43 = vpop.f32.mrb[3].mxu1 }
 0x2ec   :  { %v345_v44 = vrot.slane %v344_v41, 4 }
 0x2ed   :  { %v353_v45 = vsel %vm108_vm2, %v352_v42, 0.0 }
 0x2ee   :  { %v346_v46 = vadd.f32 %v345_v44, %v344_v41  ;;  %v354_v3 = vrot.slane %v353_v45, 4 }
 0x2f0   :  { %v347_v47 = vrot.slane %v346_v46, 2  ;;  %v355_v49 = vadd.f32 %v354_v3, %v353_v45 }
 0x2f2   :  { %v348_v50 = vadd.f32 %v347_v47, %v346_v46  ;;  %v356_v51 = vrot.slane %v355_v49, 2 }
 0x2f4   :  { %v349_v53 = vrot.slane %v348_v50, 1  ;;  %v357_v54 = vadd.f32 %v356_v51, %v355_v49 }
 0x2f6   :  { %v350_v55 = vadd.f32 %v349_v53, %v348_v50  ;;  %v358_v56 = vrot.slane %v357_v54, 1 }
 0x2f8   :  { %v351_v57 = vmul.f32 0.125, %v350_v55  ;;  %v359_v58 = vadd.f32 %v358_v56, %v357_v54 }
 0x2fa   :  { %v360_v59 = vmul.f32 0.125, %v359_v58  ;;  %v361_v60 = vmul.f32 %v351_v57, %v351_v57 }
 0x2fc   :  { %v362_v61 = vsub.f32 %v360_v59, %v361_v60 }
 0x2fe   :  { %v363_v62 = vadd.f32 1e-05, %v362_v61 }
 0x300   :  { %607 = vrsqrt.f32 %v363_v62 }
 0x30a   :  { %v608_v0 = vpop.eup %607 }
 0x30b   :  { %v365_v1 = vmul.f32 %v608_v0, %v490_v63 }
 0x30d   :  { %v366_v2 = vmul.f32 %v365_v1, %v351_v57  ;;  %v374_v5 = vrot.slane %v365_v1, %v730_v48 }
 0x30f   :  { %v368_v4 = vrot.slane %v366_v2, 7  ;;  %v375_v7 = vmul.f32 %v374_v5, %v338_v40 }
 0x311   :  { %v370_v6 = vsub.f32 %v490_v63, %v368_v4 }
 0x313   :  { %v379_v8 = vrot.slane %v370_v6, %v733_v52 }
 0x315   :  { %v380_v9 = vadd.f32 %v379_v8, %v375_v7 }
 0x317   :  { %v381_v10 = vmax.f32 %v380_v9, 0.0 }
 0x319   :  { %567 = vmatmul.mubr.msk.f32.vlgmr.msra.gmra.mrb[2].mxu0 %vm108_vm2, %v381_v10 }
 0x3ec   :  { %v462_v12 = vpop.f32.mrb[2].mxu0 }
 0x3ed   :  { %v463_v13 = vadd.f32 %v491_v11, %v462_v12  ;;  %v568_v14 = vpop.f32.mrb[3].mxu0 }
 0x3ef   :  { %467 = vst.msk [vmem:[#allocation2] sm:$0xff] %vm466_vm3, %v463_v13 }
 0x3f0   :  { %620 = shalt.err (!%p617_p4)
}
 0x3f1   :  { %s621_s21 = scalar_lea.hbm %s802_s6, 128 }
 0x3f2   :  { %p622_p5 = scmp.ne.s32.totalorder %s802_s6, %s621_s21  ;;  %p625_p6 = scmp.lt.u32.totalorder %s621_s21, %s802_s6 }
 0x3f4   :  { %p627_p7 = pnand %p625_p6, %p622_p5 }
 0x3f6   :  { %630 = shalt.err (!%p627_p7)
}
 0x3f7   :  { %477 = dma.vmem_to_hbm [thread:$0]  %s475_s3, 128, %s802_s6, [#allocation3]  }
 0x3f8   :  { %631 = dma.done.wait [#allocation3], 128  }
 0x3f9   :  { %632 = vsyncadd [#allocation3], 4294967168 }
 0x3fa   :  { %481 = vsyncpa [#allocation3], 1 }

</bundles_post_ra>
